<compile_context>
chip_gen: v5e
topology: v5e:2x2
jax: 0.10.0
libtpu: 0.0.40
codegen_flags: <defaults>
</compile_context>

<pallas_src>
import functools
import math

import jax
import jax.numpy as jnp
from jax import lax
from jax.experimental import pallas as pl
from jax.experimental.pallas import tpu as pltpu


def _geglu_kernel(x_ref, wh_ref, wg_ref, bh_ref, bg_ref, o_ref, acc_h, acc_g,
                  *, approximate_gelu):
    # x_ref: (tm, tk)   wh_ref/wg_ref: (tk, tn)   bh_ref/bg_ref: (1, tn) f32
    # o_ref: (tm, tn)   acc_h/acc_g: (tm, tn) f32 scratch
    k = pl.program_id(2)

    @pl.when(k == 0)
    def _():
        # Fold the bias into the accumulator init (frees the epilogue of two adds).
        acc_h[...] = jnp.broadcast_to(bh_ref[...], acc_h.shape)
        acc_g[...] = jnp.broadcast_to(bg_ref[...], acc_g.shape)

    x = x_ref[...]
    acc_h[...] += jnp.dot(x, wh_ref[...], preferred_element_type=jnp.float32)
    acc_g[...] += jnp.dot(x, wg_ref[...], preferred_element_type=jnp.float32)

    @pl.when(k == pl.num_programs(2) - 1)
    def _():
        h = acc_h[...]
        g = acc_g[...]
        if approximate_gelu:
            # tanh approximation -> EUP (separate VLIW slot); cheaper VALU tail.
            c = math.sqrt(2.0 / math.pi)
            gelu_g = 0.5 * g * (1.0 + jnp.tanh(c * (g + 0.044715 * g * g * g)))
        else:
            # exact erf GELU, matching torch.nn.functional.gelu default.
            gelu_g = 0.5 * g * (1.0 + lax.erf(g * (1.0 / math.sqrt(2.0))))
        o_ref[...] = (h * gelu_g).astype(o_ref.dtype)


def _round_up(x, m):
    return (x + m - 1) // m * m


def _fit_tile(dim, target, align):
    """Tile <= ~target, multiple of `align`, chosen to minimize padding of `dim`."""
    if dim <= target:
        return max(align, _round_up(dim, align))
    n_blocks = -(-dim // target)
    return max(align, _round_up(-(-dim // n_blocks), align))


def _vmem_capacity_bytes():
    try:
        return int(pltpu.get_tpu_info().vmem_capacity_bytes)
    except Exception:
        return 64 * 1024 * 1024  # conservative fallback (v7x per-TC budget)


def geglu(x, w, b, *, tm=None, tn=None, tk=None, compute_dtype=None,
          approximate_gelu=False):
    """GEGLU forward.

    x: (..., dim_in), w: (dim_in, 2*dim_out), b: (2*dim_out,) -> (..., dim_out).
    compute_dtype=None: bf16 compute for f32 inputs (default, fast MXU path);
    pass jnp.float32 for exact parity. Accumulation is always f32.
    """
    dim_in = x.shape[-1]
    dim_out = w.shape[-1] // 2
    lead_shape = x.shape[:-1]
    out_dtype = x.dtype

    if compute_dtype is None:
        cdt = jnp.dtype(jnp.bfloat16) if x.dtype == jnp.float32 else jnp.dtype(x.dtype)
    else:
        cdt = jnp.dtype(compute_dtype)

    x2 = x.reshape(-1, dim_in)
    M = x2.shape[0]

    in_isz = cdt.itemsize
    out_isz = jnp.dtype(out_dtype).itemsize
    sublane = {4: 8, 2: 16, 1: 32}.get(in_isz, 8)

    vmem_cap = _vmem_capacity_bytes()
    budget = int(vmem_cap * 0.70)          # per-step footprint budget
    vmem_limit = int(vmem_cap * 0.75)      # scoped-VMEM limit (headroom for Mosaic)

    # Large MXU-saturating targets; clamp to the problem with padding-minimizing,
    # dtype-aligned tiles, then shrink if the double-buffered footprint busts VMEM.
    tm_t = 1024 if tm is None else tm
    tn_t = 1024 if tn is None else tn
    tk_t = 512 if tk is None else tk

    tm = _fit_tile(M, tm_t, sublane)
    tn = _fit_tile(dim_out, tn_t, 128)
    tk = _fit_tile(dim_in, tk_t, 128)

    def footprint(tm_, tn_, tk_):
        return (2 * tm_ * tk_ * in_isz          # x tile (double buffered)
                + 4 * tk_ * tn_ * in_isz        # w_h + w_gate tiles
                + 4 * tn_ * 4                   # bias tiles
                + 2 * tm_ * tn_ * out_isz       # output tile
                + 2 * tm_ * tn_ * 4)            # two f32 accumulators

    while footprint(tm, tn, tk) > budget:
        if tn > 128 and tn >= tm:
            tn = max(128, _round_up(tn // 2, 128))
        elif tm > sublane:
            tm = max(sublane, _round_up(tm // 2, sublane))
        elif tk > 128:
            tk = max(128, _round_up(tk // 2, 128))
        else:
            break

    Mp = _round_up(M, tm)
    Np = _round_up(dim_out, tn)
    Kp = _round_up(dim_in, tk)

    # --- x: cast / pad only when needed (skip the copy when already aligned) ---
    x_in = x2 if x2.dtype == cdt else x2.astype(cdt)
    if Mp != M or Kp != dim_in:
        x_in = jnp.pad(x_in, ((0, Mp - M), (0, Kp - dim_in)))
    x_spec = pl.BlockSpec((tm, tk), lambda i, j, k: (i, k))

    # --- weight halves: index the original W directly when the h/gate split is
    #     tile-aligned (no split/pad copies); fall back to padded halves otherwise.
    if dim_out % tn == 0 and Kp == dim_in:
        gate_off = dim_out // tn
        w_in = w if w.dtype == cdt else w.astype(cdt)
        wh_in = w_in
        wg_in = w_in
        wh_spec = pl.BlockSpec((tk, tn), lambda i, j, k: (k, j))
        wg_spec = pl.BlockSpec((tk, tn), lambda i, j, k: (k, j + gate_off))
    else:
        wh_in = jnp.pad(w[:, :dim_out].astype(cdt),
                        ((0, Kp - dim_in), (0, Np - dim_out)))
        wg_in = jnp.pad(w[:, dim_out:].astype(cdt),
                        ((0, Kp - dim_in), (0, Np - dim_out)))
        wh_spec = pl.BlockSpec((tk, tn), lambda i, j, k: (k, j))
        wg_spec = pl.BlockSpec((tk, tn), lambda i, j, k: (k, j))

    # --- biases (f32; folded into accumulator init inside the kernel) ---
    b_f32 = b.astype(jnp.float32).reshape(1, 2 * dim_out)
    if dim_out % tn == 0:
        gate_off_b = dim_out // tn
        bh_in = b_f32
        bg_in = b_f32
        bh_spec = pl.BlockSpec((1, tn), lambda i, j, k: (0, j))
        bg_spec = pl.BlockSpec((1, tn), lambda i, j, k: (0, j + gate_off_b))
    else:
        bh_in = jnp.pad(b_f32[:, :dim_out], ((0, 0), (0, Np - dim_out)))
        bg_in = jnp.pad(b_f32[:, dim_out:], ((0, 0), (0, Np - dim_out)))
        bh_spec = pl.BlockSpec((1, tn), lambda i, j, k: (0, j))
        bg_spec = pl.BlockSpec((1, tn), lambda i, j, k: (0, j))

    grid = (Mp // tm, Np // tn, Kp // tk)

    flops = 2 * Mp * Kp * (2 * Np) + 10 * Mp * Np
    bytes_accessed = (Mp * Kp * in_isz + 2 * Kp * Np * in_isz
                      + 2 * Np * 4 + Mp * Np * out_isz)

    kernel = functools.partial(_geglu_kernel, approximate_gelu=approximate_gelu)

    out2 = pl.pallas_call(
        kernel,
        out_shape=jax.ShapeDtypeStruct((Mp, Np), out_dtype),
        grid_spec=pltpu.PrefetchScalarGridSpec(
            num_scalar_prefetch=0,
            grid=grid,
            in_specs=[x_spec, wh_spec, wg_spec, bh_spec, bg_spec],
            out_specs=pl.BlockSpec((tm, tn), lambda i, j, k: (i, j)),
            scratch_shapes=[
                pltpu.VMEM((tm, tn), jnp.float32),   # acc_h
                pltpu.VMEM((tm, tn), jnp.float32),   # acc_gate
            ],
        ),
        compiler_params=pltpu.CompilerParams(
            # M/N are independent (megacore-splittable on v7x, usually along M which
            # has the most blocks); K is the reduction so it must stay "arbitrary".
            dimension_semantics=("parallel", "parallel", "arbitrary"),
            vmem_limit_bytes=vmem_limit,
        ),
        cost_estimate=pl.CostEstimate(
            flops=flops,
            transcendentals=Mp * Np,
            bytes_accessed=bytes_accessed,
        ),
    )(x_in, wh_in, wg_in, bh_in, bg_in)

    return out2[:M, :dim_out].reshape(*lead_shape, dim_out)


def _reference_geglu(x, w, b):
    proj = jnp.einsum("...i,io->...o", x.astype(jnp.float32),
                      w.astype(jnp.float32)) + b.astype(jnp.float32)
    h, gate = jnp.split(proj, 2, axis=-1)
    return h * (0.5 * gate * (1.0 + lax.erf(gate / jnp.sqrt(2.0))))


if __name__ == "__main__":
    key = jax.random.PRNGKey(0)

    def make_inputs(k, batch, seq, dim_in, dim_out):
        kx, kw, kb = jax.random.split(k, 3)
        bound = 1.0 / math.sqrt(dim_in)
        x = jax.random.normal(kx, (batch, seq, dim_in), dtype=jnp.float32)
        w = jax.random.uniform(kw, (dim_in, 2 * dim_out), minval=-bound,
                               maxval=bound, dtype=jnp.float32)
        b = jax.random.uniform(kb, (2 * dim_out,), minval=-bound, maxval=bound,
                               dtype=jnp.float32)
        return x, w, b

    k1, k2, k3 = jax.random.split(key, 3)

    # 1) small, ragged shapes -> padded/split fallback path, bf16-by-default compute.
    x, w, b = make_inputs(k1, batch=2, seq=7, dim_in=48, dim_out=40)
    out = jax.block_until_ready(geglu(x, w, b))
    ref = _reference_geglu(x, w, b)
    assert out.shape == (2, 7, 40)
    assert jnp.allclose(out, ref, atol=5e-2, rtol=5e-2), \
        float(jnp.max(jnp.abs(out - ref)))

    # 2) tile-aligned shapes -> zero-copy direct-W (gate offset index_map) path.
    x, w, b = make_inputs(k2, batch=2, seq=64, dim_in=128, dim_out=128)
    out = jax.block_until_ready(geglu(x, w, b))
    ref = _reference_geglu(x, w, b)
    assert out.shape == (2, 64, 128)
    assert jnp.allclose(out, ref, atol=5e-2, rtol=5e-2), \
        float(jnp.max(jnp.abs(out - ref)))

    # 3) exact f32 parity mode (matches torch default erf-GELU to float tolerance).
    x, w, b = make_inputs(k3, batch=2, seq=8, dim_in=32, dim_out=32)
    out = jax.block_until_ready(geglu(x, w, b, compute_dtype=jnp.float32))
    ref = _reference_geglu(x, w, b)
    assert out.shape == (2, 8, 32)
    assert jnp.allclose(out, ref, atol=1e-5, rtol=1e-5)

    print("KERNEL_OK")
</pallas_src>

<mosaic_0001>
module attributes {stable_mosaic.version = 11 : i64} {
  func.func @_geglu_kernel(%arg0: i32, %arg1: i32, %arg2: i32, %arg3: memref<16x128xbf16, #tpu.memory_space<vmem>>, %arg4: memref<128x128xbf16, #tpu.memory_space<vmem>>, %arg5: memref<128x128xbf16, #tpu.memory_space<vmem>>, %arg6: memref<1x128xf32, #tpu.memory_space<vmem>>, %arg7: memref<1x128xf32, #tpu.memory_space<vmem>>, %arg8: memref<16x128xf32, #tpu.memory_space<vmem>>, %arg9: memref<16x128xf32, #tpu.memory_space<vmem>>, %arg10: memref<16x128xf32, #tpu.memory_space<vmem>>) attributes {dimension_semantics = [#tpu.dimension_semantics<parallel>, #tpu.dimension_semantics<parallel>, #tpu.dimension_semantics<arbitrary>], iteration_bounds = array<i64: 1, 1, 1>, scalar_prefetch = 0 : i64, scratch_operands = 2 : i64, tpu.core_type = #tpu.core_type<tc>, window_params = [{transform_indices = @transform_0, window_bounds = array<i64: 16, 128>}, {transform_indices = @transform_1, window_bounds = array<i64: 128, 128>}, {transform_indices = @transform_2, window_bounds = array<i64: 128, 128>}, {transform_indices = @transform_3, window_bounds = array<i64: 1, 128>}, {transform_indices = @transform_4, window_bounds = array<i64: 1, 128>}, {transform_indices = @transform_5, window_bounds = array<i64: 16, 128>}]} {
    %c0_i32 = arith.constant 0 : i32
    %0 = arith.cmpi eq, %arg2, %c0_i32 : i32
    %1 = arith.extui %0 : i1 to i32
    %c0_i32_0 = arith.constant 0 : i32
    %2 = arith.cmpi ne, %1, %c0_i32_0 : i32
    scf.if %2 {
      %c0_17 = arith.constant 0 : index
      %c0_18 = arith.constant 0 : index
      %17 = vector.load %arg6[%c0_17, %c0_18] : memref<1x128xf32, #tpu.memory_space<vmem>>, vector<1x128xf32>
      %18 = vector.shape_cast %17 : vector<1x128xf32> to vector<1x128xf32>
      %19 = vector.broadcast %18 : vector<1x128xf32> to vector<16x128xf32>
      %c0_19 = arith.constant 0 : index
      %c0_20 = arith.constant 0 : index
      %20 = vector.load %arg9[%c0_19, %c0_20] : memref<16x128xf32, #tpu.memory_space<vmem>>, vector<16x128xf32>
      tpu.vector_store %arg9[%c0_19, %c0_20], %19 {strides = array<i32>} : memref<16x128xf32, #tpu.memory_space<vmem>>, vector<16x128xf32>,
      %c0_21 = arith.constant 0 : index
      %c0_22 = arith.constant 0 : index
      %21 = vector.load %arg7[%c0_21, %c0_22] : memref<1x128xf32, #tpu.memory_space<vmem>>, vector<1x128xf32>
      %22 = vector.shape_cast %21 : vector<1x128xf32> to vector<1x128xf32>
      %23 = vector.broadcast %22 : vector<1x128xf32> to vector<16x128xf32>
      %c0_23 = arith.constant 0 : index
      %c0_24 = arith.constant 0 : index
      %24 = vector.load %arg10[%c0_23, %c0_24] : memref<16x128xf32, #tpu.memory_space<vmem>>, vector<16x128xf32>
      tpu.vector_store %arg10[%c0_23, %c0_24], %23 {strides = array<i32>} : memref<16x128xf32, #tpu.memory_space<vmem>>, vector<16x128xf32>,
    } else {
    }
    %c0 = arith.constant 0 : index
    %c0_1 = arith.constant 0 : index
    %3 = vector.load %arg3[%c0, %c0_1] : memref<16x128xbf16, #tpu.memory_space<vmem>>, vector<16x128xbf16>
    %c0_2 = arith.constant 0 : index
    %c0_3 = arith.constant 0 : index
    %4 = vector.load %arg9[%c0_2, %c0_3] : memref<16x128xf32, #tpu.memory_space<vmem>>, vector<16x128xf32>
    %c0_4 = arith.constant 0 : index
    %c0_5 = arith.constant 0 : index
    %5 = vector.load %arg4[%c0_4, %c0_5] : memref<128x128xbf16, #tpu.memory_space<vmem>>, vector<128x128xbf16>
    %cst = arith.constant dense<0.000000e+00> : vector<16x128xf32>
    %6 = tpu.matmul %3, %5, %cst {dimension_numbers = #tpu.dot_dimension_numbers<[1], [0], [0], [1], [0, 0, 1, 1], [], []>} : vector<16x128xbf16>, vector<128x128xbf16>, vector<16x128xf32> -> vector<16x128xf32>
    %7 = arith.addf %4, %6 : vector<16x128xf32>
    %c0_6 = arith.constant 0 : index
    %c0_7 = arith.constant 0 : index
    %8 = vector.load %arg9[%c0_6, %c0_7] : memref<16x128xf32, #tpu.memory_space<vmem>>, vector<16x128xf32>
    tpu.vector_store %arg9[%c0_6, %c0_7], %7 {strides = array<i32>} : memref<16x128xf32, #tpu.memory_space<vmem>>, vector<16x128xf32>,
    %c0_8 = arith.constant 0 : index
    %c0_9 = arith.constant 0 : index
    %9 = vector.load %arg10[%c0_8, %c0_9] : memref<16x128xf32, #tpu.memory_space<vmem>>, vector<16x128xf32>
    %c0_10 = arith.constant 0 : index
    %c0_11 = arith.constant 0 : index
    %10 = vector.load %arg5[%c0_10, %c0_11] : memref<128x128xbf16, #tpu.memory_space<vmem>>, vector<128x128xbf16>
    %cst_12 = arith.constant dense<0.000000e+00> : vector<16x128xf32>
    %11 = tpu.matmul %3, %10, %cst_12 {dimension_numbers = #tpu.dot_dimension_numbers<[1], [0], [0], [1], [0, 0, 1, 1], [], []>} : vector<16x128xbf16>, vector<128x128xbf16>, vector<16x128xf32> -> vector<16x128xf32>
    %12 = arith.addf %9, %11 : vector<16x128xf32>
    %c0_13 = arith.constant 0 : index
    %c0_14 = arith.constant 0 : index
    %13 = vector.load %arg10[%c0_13, %c0_14] : memref<16x128xf32, #tpu.memory_space<vmem>>, vector<16x128xf32>
    tpu.vector_store %arg10[%c0_13, %c0_14], %12 {strides = array<i32>} : memref<16x128xf32, #tpu.memory_space<vmem>>, vector<16x128xf32>,
    %c0_i32_15 = arith.constant 0 : i32
    %14 = arith.cmpi eq, %arg2, %c0_i32_15 : i32
    %15 = arith.extui %14 : i1 to i32
    %c0_i32_16 = arith.constant 0 : i32
    %16 = arith.cmpi ne, %15, %c0_i32_16 : i32
    scf.if %16 {
      %c0_17 = arith.constant 0 : index
      %c0_18 = arith.constant 0 : index
      %17 = vector.load %arg9[%c0_17, %c0_18] : memref<16x128xf32, #tpu.memory_space<vmem>>, vector<16x128xf32>
      %c0_19 = arith.constant 0 : index
      %c0_20 = arith.constant 0 : index
      %18 = vector.load %arg10[%c0_19, %c0_20] : memref<16x128xf32, #tpu.memory_space<vmem>>, vector<16x128xf32>
      %cst_21 = arith.constant 5.000000e-01 : f32
      %19 = vector.broadcast %cst_21 : f32 to vector<16x128xf32>
      %20 = arith.mulf %19, %18 : vector<16x128xf32>
      %cst_22 = arith.constant 0.707106769 : f32
      %21 = vector.broadcast %cst_22 : f32 to vector<16x128xf32>
      %22 = arith.mulf %18, %21 : vector<16x128xf32>
      %23 = math.erf %22 : vector<16x128xf32>
      %cst_23 = arith.constant 1.000000e+00 : f32
      %24 = vector.broadcast %cst_23 : f32 to vector<16x128xf32>
      %25 = arith.addf %24, %23 : vector<16x128xf32>
      %26 = arith.mulf %20, %25 : vector<16x128xf32>
      %27 = arith.mulf %17, %26 : vector<16x128xf32>
      %c0_24 = arith.constant 0 : index
      %c0_25 = arith.constant 0 : index
      %28 = vector.load %arg8[%c0_24, %c0_25] : memref<16x128xf32, #tpu.memory_space<vmem>>, vector<16x128xf32>
      tpu.vector_store %arg8[%c0_24, %c0_25], %27 {strides = array<i32>} : memref<16x128xf32, #tpu.memory_space<vmem>>, vector<16x128xf32>,
    } else {
    }
    return
  }
  func.func @transform_0(%arg0: i32, %arg1: i32, %arg2: i32) -> (i32, i32) {
    %c0_i32 = arith.constant 0 : i32
    return %arg0, %arg2 : i32, i32
  }
  func.func @transform_1(%arg0: i32, %arg1: i32, %arg2: i32) -> (i32, i32) {
    %c0_i32 = arith.constant 0 : i32
    return %arg2, %arg1 : i32, i32
  }
  func.func @transform_2(%arg0: i32, %arg1: i32, %arg2: i32) -> (i32, i32) {
    %c0_i32 = arith.constant 0 : i32
    return %arg2, %arg1 : i32, i32
  }
  func.func @transform_3(%arg0: i32, %arg1: i32, %arg2: i32) -> (i32, i32) {
    %c0_i32 = arith.constant 0 : i32
    %c0_i32_0 = arith.constant 0 : i32
    return %c0_i32, %arg1 : i32, i32
  }
  func.func @transform_4(%arg0: i32, %arg1: i32, %arg2: i32) -> (i32, i32) {
    %c0_i32 = arith.constant 0 : i32
    %c0_i32_0 = arith.constant 0 : i32
    return %c0_i32, %arg1 : i32, i32
  }
  func.func @transform_5(%arg0: i32, %arg1: i32, %arg2: i32) -> (i32, i32) {
    %c0_i32 = arith.constant 0 : i32
    return %arg0, %arg1 : i32, i32
  }
}

</mosaic_0001>

<bundles_post_ra>
// kernel: tpu_custom_call.1
= control target key start
LH: loop header
LB: loop body
LE: loop exit
PB: predicated region body
PF: predicated region fallthrough
CT: control target
= control target key end

     0   :  { %10 = vsyncpa [#allocation5], 0  ;;  %s651_s0 = inlined_call_operand.hbm [shape: bf16[16,128], index: 0, kind: input, shape index: {}]   ;;  %s652_s1 = inlined_call_operand.hbm [shape: bf16[128,128], index: 1, kind: input, shape index: {}]   ;;  %s653_s2 = inlined_call_operand.hbm [shape: bf16[128,128], index: 2, kind: input, shape index: {}]   ;;  %s654_s3 = inlined_call_operand.vmem [shape: f32[1,128], index: 3, kind: input, shape index: {}]   ;;  %s655_s4 = inlined_call_operand.vmem [shape: f32[1,128], index: 4, kind: input, shape index: {}]   ;;  %s656_s5 = inlined_call_operand.hbm [shape: f32[16,128], index: 5, kind: output, shape index: {}]  }
   0x1   :  { %11 = vsyncpa [#allocation8], 0 }
   0x2   :  { %12 = vsyncpa [#allocation6], 0  ;;  %s30_s20 = sshll.u32 %s652_s1, 4  ;;  %s582_s21 = smov [#allocation7]   ;;  %s31_s20 = int_to_ptr.hbm [resolvable:$true] %s30_s20 }
   0x3   :  { %s32_s22 = sshll.u32 %s582_s21, 4  ;;  %s17_s25 = sshll.u32 %s651_s0, 4  ;;  %s33_s22 = int_to_ptr.vmem [resolvable:$true] %s32_s22  ;;  %s18_s25 = int_to_ptr.hbm [resolvable:$true] %s17_s25 }
   0x4   :  { %s583_s26 = smov 64   ;;  %s584_s27 = smov 4  }
   0x5   :  { %38 = dma.hbm_to_vmem [thread:$0]  %s31_s20, 1024, %s33_s22, [#allocation8], %s583_s26, %s583_s26, %s584_s27  }
   0x6   :  { %s585_s28 = smov [#allocation4]   ;;  %s43_s7 = sshll.u32 %s653_s2, 4  ;;  %s44_s7 = int_to_ptr.hbm [resolvable:$true] %s43_s7 }
   0x7   :  { %s19_s29 = sshll.u32 %s585_s28, 4  ;;  %s586_s1 = smov [#allocation9]   ;;  %s20_s29 = int_to_ptr.vmem [resolvable:$true] %s19_s29 }
   0x8   :  { %25 = dma.hbm_to_vmem [thread:$0]  %s18_s25, 128, %s20_s29, [#allocation5], %s583_s26, %s583_s26, %s584_s27  }
   0x9   :  { %s45_s8 = sshll.u32 %s586_s1, 4  ;;  %s46_s8 = int_to_ptr.vmem [resolvable:$true] %s45_s8 }
   0xa   :  { %51 = dma.hbm_to_vmem [thread:$0]  %s44_s7, 1024, %s46_s8, [#allocation8], %s583_s26, %s583_s26, %s584_s27  }
   0xb   :  { %576 = dma.done.wait [#allocation5], 128  }
   0xc   :  { %577 = vsyncadd [#allocation5], 4294967168 }
   0xd   :  { %578 = dma.done.wait [#allocation8], 2048  }
   0xe   :  { %579 = vsyncadd [#allocation8], 4294965248  ;;  %v465_v0 = vld [vmem:[#allocation9 + $0x38] sm:$0xff]  ;;  %v464_v1 = vld [vmem:[#allocation9 + $0x30] sm:$0xff]  ;;  %s365_s13 = sshll.u32 %s656_s5, 4  ;;  %s588_s14 = smov 128   ;;  %s366_s13 = int_to_ptr.hbm [resolvable:$true] %s365_s13 }
   0xf   :  { %242 = vmatpush.bf16.msra.mxu1 %v465_v0  ;;  %v457_v2 = vld [vmem:[#allocation7 + $0x38] sm:$0xff]  ;;  %v456_v3 = vld [vmem:[#allocation7 + $0x30] sm:$0xff]  ;;  %v463_v4 = vld [vmem:[#allocation9 + $0x28] sm:$0xff]  ;;  %s589_s15 = smov 8  }
  0x10   :  { %158 = vmatpush.bf16.msra.mxu0 %v457_v2  ;;  %v455_v5 = vld [vmem:[#allocation7 + $0x28] sm:$0xff]  ;;  %v462_v6 = vld [vmem:[#allocation9 + $0x20] sm:$0xff]  ;;  %v461_v8 = vld [vmem:[#allocation9 + $0x18] sm:$0xff] }
  0x11   :  { %v454_v7 = vld [vmem:[#allocation7 + $0x20] sm:$0xff]  ;;  %v453_v9 = vld [vmem:[#allocation7 + $0x18] sm:$0xff]  ;;  %v460_v10 = vld [vmem:[#allocation9 + $0x10] sm:$0xff] }
  0x12   :  { %v452_v11 = vld [vmem:[#allocation7 + $0x10] sm:$0xff]  ;;  %v459_v12 = vld [vmem:[#allocation9 + $0x8] sm:$0xff]  ;;  %v458_v14 = vld [vmem:[#allocation9] sm:$0xff] }
  0x13   :  { %243 = vmatpush.bf16.msra.mxu1 %v464_v1  ;;  %v451_v13 = vld [vmem:[#allocation7 + $0x8] sm:$0xff]  ;;  %v449_v15 = vld [vmem:[#allocation4] sm:$0xff]  ;;  %v450_v16 = vld [vmem:[#allocation7] sm:$0xff] }
  0x14   :  { %159 = vmatpush.bf16.msra.mxu0 %v456_v3  ;;  %v474_v17 = vld [vmem:[%s655_s4] ss:$0 sm:$0xff] }
  0x17   :  { %244 = vmatpush.bf16.msra.mxu1 %v463_v4 }
  0x18   :  { %160 = vmatpush.bf16.msra.mxu0 %v455_v5 }
  0x1b   :  { %245 = vmatpush.bf16.msra.mxu1 %v462_v6 }
  0x1c   :  { %161 = vmatpush.bf16.msra.mxu0 %v454_v7 }
  0x1f   :  { %246 = vmatpush.bf16.msra.mxu1 %v461_v8 }
  0x20   :  { %162 = vmatpush.bf16.msra.mxu0 %v453_v9 }
  0x23   :  { %247 = vmatpush.bf16.msra.mxu1 %v460_v10 }
  0x24   :  { %163 = vmatpush.bf16.msra.mxu0 %v452_v11 }
  0x27   :  { %248 = vmatpush.bf16.msra.mxu1 %v459_v12 }
  0x28   :  { %164 = vmatpush.bf16.msra.mxu0 %v451_v13 }
  0x2b   :  { %249 = vmatpush.bf16.msra.mxu1 %v458_v14 }
  0x2c   :  { %165 = vmatpush.bf16.msra.mxu0 %v450_v16 }
  0x2e   :  { %250 = vmatmul.bf16.vlgmr.msra.gmra.mxu1 %v449_v15 }
  0x2f   :  { %166 = vmatmul.bf16.vlgmr.msra.gmra.mxu0 %v449_v15 }
  0xab   :  { %v251_v18 = vpop.f32.mrf.mxu1 }
  0xac   :  { %v632_v19 = vadd.f32 %v474_v17, %v251_v18 }
  0xae   :  { %v269_v20 = vmul.f32 0.70710677, %v632_v19 }
  0xb0   :  { %v271_v21 = vmul.f32 %v269_v20, %v269_v20 }
  0xb2   :  { %v272_v22 = vmin.f32 %v271_v21, 16.0 }
  0xb3   :  { %v253_v23 = vpop.f32.mrf.mxu1 }
  0xb4   :  { %v273_v24 = vmul.f32 2.1237322e-06, %v272_v22  ;;  %v284_v25 = vmul.f32 3.8918573e-05, %v272_v22  ;;  %v635_v26 = vadd.f32 %v474_v17, %v253_v23  ;;  %v475_v17 = vld [vmem:[%s654_s3] ss:$0 sm:$0xff] }
  0xb5   :  { %s587_s3 = smov [#allocation10]  }
  0xb6   :  { %v274_v27 = vadd.f32 0.00028619796, %v273_v24  ;;  %v285_v28 = vadd.f32 0.001143296, %v284_v25  ;;  %v638_v29 = vmul.f32 0.70710677, %v635_v26 }
  0xb7   :  { %s363_s10 = sshll.u32 %s587_s3, 4  ;;  %s364_s10 = int_to_ptr.vmem [resolvable:$true] %s363_s10 }
  0xb8   :  { %v275_v30 = vmul.f32 %v274_v27, %v272_v22  ;;  %v286_v31 = vmul.f32 %v285_v28, %v272_v22  ;;  %v311_v32 = vmul.f32 %v638_v29, %v638_v29 }
  0xba   :  { %v287_v33 = vadd.f32 0.014752088, %v286_v31  ;;  %v276_v34 = vadd.f32 0.0036580483, %v275_v30  ;;  %v312_v35 = vmin.f32 %v311_v32, 16.0 }
  0xbc   :  { %v288_v36 = vmul.f32 %v287_v33, %v272_v22  ;;  %v313_v37 = vmul.f32 2.1237322e-06, %v312_v35  ;;  %v324_v38 = vmul.f32 3.8918573e-05, %v312_v35  ;;  %v277_v40 = vmul.f32 %v276_v34, %v272_v22 }
  0xbe   :  { %v289_v39 = vadd.f32 0.112945676, %v288_v36  ;;  %v314_v41 = vadd.f32 0.00028619796, %v313_v37  ;;  %v325_v42 = vadd.f32 0.001143296, %v324_v38 }
  0xbf   :  { %v278_v47 = vadd.f32 0.05243302, %v277_v40 }
  0xc0   :  { %v290_v43 = vmul.f32 %v289_v39, %v272_v22  ;;  %v315_v44 = vmul.f32 %v314_v41, %v312_v35  ;;  %v326_v45 = vmul.f32 %v325_v42, %v312_v35  ;;  %v268_v41 = vmul.f32 0.5, %v635_v26 }
  0xc1   :  { %v279_v53 = vmul.f32 %v278_v47, %v272_v22 }
  0xc2   :  { %v291_v46 = vadd.f32 0.4994258, %v290_v43  ;;  %v327_v48 = vadd.f32 0.014752088, %v326_v45  ;;  %v316_v50 = vadd.f32 0.0036580483, %v315_v44 }
  0xc3   :  { %v280_v57 = vadd.f32 0.18741608, %v279_v53 }
  0xc4   :  { %v292_v49 = vmul.f32 %v291_v46, %v272_v22  ;;  %v328_v51 = vmul.f32 %v327_v48, %v312_v35  ;;  %v317_v55 = vmul.f32 %v316_v50, %v312_v35 }
  0xc5   :  { %v281_v62 = vmul.f32 %v280_v57, %v272_v22  ;;  %v167_v22 = vpop.f32.mrf.mxu0 }
  0xc6   :  { %v293_v52 = vadd.f32 1.0, %v292_v49  ;;  %v329_v54 = vadd.f32 0.112945676, %v328_v51  ;;  %v318_v59 = vadd.f32 0.05243302, %v317_v55  ;;  %v172_v28 = vadd.f32 %v475_v17, %v167_v22 }
  0xc7   :  { %v282_v4 = vadd.f32 1.1283791, %v281_v62 }
  0xc8   :  { %476 = vrcp.f32 %v293_v52  ;;  %v330_v56 = vmul.f32 %v329_v54, %v312_v35  ;;  %v319_v1 = vmul.f32 %v318_v59, %v312_v35  ;;  %v305_v3 = vand.u32 2147483648, %v293_v52 }
  0xc9   :  { %v303_v6 = vand.u32 2147483647, %v293_v52  ;;  %vm299_vm1 = vweird.f32 %v293_v52  ;;  %v283_v11 = vmul.f32 %v282_v4, %v269_v20  ;;  %v267_v20 = vmul.f32 0.5, %v632_v19 }
  0xca   :  { %v331_v58 = vadd.f32 0.4994258, %v330_v56  ;;  %v320_v7 = vadd.f32 0.18741608, %v319_v1  ;;  %v306_v9 = vor.u32 1.1754944e-38, %v305_v3 }
  0xcb   :  { %vm304_vm3 = vcmp.eq.f32.partialorder %v303_v6, 8.507059e+37 }
  0xcc   :  { %v332_v60 = vmul.f32 %v331_v58, %v312_v35  ;;  %v321_v14 = vmul.f32 %v320_v7, %v312_v35 }
  0xcd   :  { %v169_v40 = vpop.f32.mrf.mxu0 }
  0xce   :  { %v477_v61 = vpop.eup %476  ;;  %v333_v0 = vadd.f32 1.0, %v332_v60  ;;  %v322_v24 = vadd.f32 1.1283791, %v321_v14  ;;  %v173_v42 = vadd.f32 %v475_v17, %v169_v40 }
  0xcf   :  { %v295_v63 = vmul.f32 %v477_v61, %v293_v52  ;;  %vm300_vm0 = vweird.f32 %v477_v61 }
  0xd0   :  { %478 = vrcp.f32 %v333_v0  ;;  %vm301_vm2 = vmor %vm299_vm1, %vm300_vm0  ;;  %v345_v21 = vand.u32 2147483648, %v333_v0  ;;  %v343_v27 = vand.u32 2147483647, %v333_v0  ;;  %vm339_vm5 = vweird.f32 %v333_v0 }
  0xd1   :  { %v296_v2 = vsub.f32 1.0, %v295_v63  ;;  %v323_v34 = vmul.f32 %v322_v24, %v638_v29 }
  0xd2   :  { %v346_v32 = vor.u32 1.1754944e-38, %v345_v21  ;;  %vm344_vm7 = vcmp.eq.f32.partialorder %v343_v27, 8.507059e+37 }
  0xd3   :  { %v297_v5 = vmul.f32 %v477_v61, %v296_v2 }
  0xd5   :  { %v298_v8 = vadd.f32 %v477_v61, %v297_v5 }
  0xd6   :  { %v479_v10 = vpop.eup %478 }
  0xd7   :  { %v302_v12 = vsel %vm301_vm2, %v477_v61, %v298_v8  ;;  %v335_v15 = vmul.f32 %v479_v10, %v333_v0  ;;  %vm340_vm4 = vweird.f32 %v479_v10 }
  0xd8   :  { %v307_v13 = vsel %vm304_vm3, %v306_v9, %v302_v12  ;;  %vm341_vm6 = vmor %vm339_vm5, %vm340_vm4 }
  0xd9   :  { %v308_v16 = vmul.f32 %v307_v13, %v283_v11  ;;  %v336_v18 = vsub.f32 1.0, %v335_v15 }
  0xdb   :  { %v447_v23 = vclamps-f32 %v308_v16, 1.0  ;;  %v337_v25 = vmul.f32 %v479_v10, %v336_v18 }
  0xdd   :  { %v351_v30 = vadd.f32 1.0, %v447_v23  ;;  %v338_v31 = vadd.f32 %v479_v10, %v337_v25 }
  0xdf   :  { %v353_v33 = vmul.f32 %v351_v30, %v267_v20  ;;  %v342_v35 = vsel %vm341_vm6, %v479_v10, %v338_v31 }
  0xe0   :  { %v347_v36 = vsel %vm344_vm7, %v346_v32, %v342_v35 }
  0xe1   :  { %v355_v37 = vmul.f32 %v353_v33, %v172_v28  ;;  %v348_v38 = vmul.f32 %v347_v36, %v323_v34 }
  0xe3   :  { %357 = vst [vmem:[#allocation10] sm:$0xff] %v355_v37  ;;  %v448_v39 = vclamps-f32 %v348_v38, 1.0 }
  0xe5   :  { %v352_v19 = vadd.f32 1.0, %v448_v39 }
  0xe7   :  { %v354_v43 = vmul.f32 %v352_v19, %v268_v41 }
  0xe9   :  { %v356_v29 = vmul.f32 %v354_v43, %v173_v42 }
  0xeb   :  { %358 = vst [vmem:[#allocation10 + $0x8] sm:$0xff] %v356_v29 }
  0xec   :  { %371 = dma.vmem_to_hbm [thread:$0]  %s364_s10, 256, %s366_s13, [#allocation6], %s588_s14, %s588_s14, %s589_s15  }
  0xed   :  { %580 = dma.done.wait [#allocation6], 256  }
  0xee   :  { %581 = vsyncadd [#allocation6], 4294967040 }
  0xef   :  { %376 = vsyncpa [#allocation5], 1 }
  0xf0   :  { %377 = vsyncpa [#allocation8], 1 }
  0xf1   :  { %378 = vsyncpa [#allocation6], 1 }

</bundles_post_ra>
